<compile_context>
chip_gen: v7x
topology: tpu7x:2x2x1
jax: 0.10.0
libtpu: 0.0.40
codegen_flags: <defaults>
</compile_context>

<pallas_src>
import jax
import jax.numpy as jnp
from jax.experimental import pallas as pl
from jax.experimental.pallas import tpu as pltpu

DIM = 3
KERNEL = 4
IN_FEATURES = KERNEL * DIM   # 12
HIDDEN = 512
V = 128                      # output dim (undefined symbol in reference; fixed here)


def _round_up(x, m):
    return (x + m - 1) // m * m


def _cdiv(a, b):
    return (a + b - 1) // b


def mlp_kernel(x_ref, w1_ref, b1_ref, w2_ref, b2_ref, w3_ref, b3_ref, o_ref):
    # fc1: bf16 operands on the MXU, f32 accumulation; bias + ReLU in f32.
    x = x_ref[...].astype(jnp.bfloat16)          # (tile_m, 12), cast in-kernel
    h1 = jnp.dot(x, w1_ref[...], preferred_element_type=jnp.float32)
    h1 = jnp.maximum(h1 + b1_ref[...], 0.0)
    # dropout1: identity (inference mode)
    h2 = jnp.dot(h1.astype(jnp.bfloat16), w2_ref[...],
                 preferred_element_type=jnp.float32)
    h2 = jnp.maximum(h2 + b2_ref[...], 0.0)
    # dropout2: identity (inference mode)
    h3 = jnp.dot(h2.astype(jnp.bfloat16), w3_ref[...],
                 preferred_element_type=jnp.float32)
    h3 = jnp.maximum(h3 + b3_ref[...], 0.0)
    o_ref[...] = h3.astype(o_ref.dtype)


def _choose_tile_m(batch, max_tile_m):
    """Pick the M tile: single block for tiny batches, otherwise >= 2 grid
    steps (megacore sharding on v7x), capped at max_tile_m rows per step."""
    padded = _round_up(batch, 8)        # sublane alignment for the block shape
    if padded <= 128:
        return padded                   # one (possibly ragged) block
    half = _round_up(_cdiv(padded, 2), 8)
    return min(max_tile_m, half)


def mlp_forward(x, params, *, max_tile_m=512):
    """x: (batch, IN_FEATURES) float32 -> (batch, V) float32."""
    w1, b1, w2, b2, w3, b3 = params     # weights bf16 (pre-cast), biases f32 (1, out)
    batch, k = x.shape
    assert k == IN_FEATURES

    tile_m = _choose_tile_m(batch, max_tile_m)
    # Ragged last block: OOB input reads are padded, OOB output writes dropped.
    grid = (_cdiv(batch, tile_m),)

    return pl.pallas_call(
        mlp_kernel,
        out_shape=jax.ShapeDtypeStruct((batch, V), jnp.float32),
        grid_spec=pl.GridSpec(
            grid=grid,
            in_specs=[
                # activations: tiled over batch, full (12-wide) last dim, f32 straight from HBM
                pl.BlockSpec((tile_m, IN_FEATURES), lambda i: (i, 0)),
                # weights / biases: full arrays, constant index_map -> VMEM-resident
                pl.BlockSpec((IN_FEATURES, HIDDEN), lambda i: (0, 0)),
                pl.BlockSpec((1, HIDDEN), lambda i: (0, 0)),
                pl.BlockSpec((HIDDEN, HIDDEN), lambda i: (0, 0)),
                pl.BlockSpec((1, HIDDEN), lambda i: (0, 0)),
                pl.BlockSpec((HIDDEN, V), lambda i: (0, 0)),
                pl.BlockSpec((1, V), lambda i: (0, 0)),
            ],
            out_specs=pl.BlockSpec((tile_m, V), lambda i: (i, 0)),
        ),
        compiler_params=pltpu.CompilerParams(
            dimension_semantics=("parallel",),      # batch axis shards across TCs (v7x)
            vmem_limit_bytes=32 * 1024 * 1024,      # headroom vs v5e's 16 MiB default
        ),
    )(x, w1, b1, w2, b2, w3, b3)


def init_params(key):
    """Deterministic init mimicking PyTorch Linear's U(-1/sqrt(fan_in), +1/sqrt(fan_in)).
    Weights stored as (in_features, out_features) and pre-cast to bf16 once;
    biases kept f32 with shape (1, out_features)."""
    ks = jax.random.split(key, 6)

    def linear(kw, kb, fan_in, fan_out):
        bound = 1.0 / jnp.sqrt(fan_in)
        w = jax.random.uniform(kw, (fan_in, fan_out), jnp.float32, -bound, bound)
        b = jax.random.uniform(kb, (1, fan_out), jnp.float32, -bound, bound)
        return w.astype(jnp.bfloat16), b

    w1, b1 = linear(ks[0], ks[1], IN_FEATURES, HIDDEN)
    w2, b2 = linear(ks[2], ks[3], HIDDEN, HIDDEN)
    w3, b3 = linear(ks[4], ks[5], HIDDEN, V)
    return (w1, b1, w2, b2, w3, b3)


if __name__ == "__main__":
    key = jax.random.PRNGKey(0)
    k_params, k_x = jax.random.split(key)

    params = init_params(k_params)

    batch = 8
    x = jax.random.normal(k_x, (batch, IN_FEATURES), dtype=jnp.float32)

    out = mlp_forward(x, params)
    out = jax.block_until_ready(out)

    # reference in plain JAX with the same bf16-operand / f32-accumulate pattern
    w1, b1, w2, b2, w3, b3 = params
    ref = jnp.maximum(
        jnp.dot(x.astype(jnp.bfloat16), w1,
                preferred_element_type=jnp.float32) + b1, 0.0)
    ref = jnp.maximum(
        jnp.dot(ref.astype(jnp.bfloat16), w2,
                preferred_element_type=jnp.float32) + b2, 0.0)
    ref = jnp.maximum(
        jnp.dot(ref.astype(jnp.bfloat16), w3,
                preferred_element_type=jnp.float32) + b3, 0.0)

    assert out.shape == (batch, V)
    assert jnp.allclose(out, ref, atol=2e-2, rtol=2e-2)

    print("KERNEL_OK")
</pallas_src>

<mosaic_0001>
module attributes {stable_mosaic.version = 11 : i64} {
  func.func @mlp_kernel(%arg0: i32, %arg1: memref<8x12xf32, #tpu.memory_space<vmem>>, %arg2: memref<12x512xbf16, #tpu.memory_space<vmem>>, %arg3: memref<1x512xf32, #tpu.memory_space<vmem>>, %arg4: memref<512x512xbf16, #tpu.memory_space<vmem>>, %arg5: memref<1x512xf32, #tpu.memory_space<vmem>>, %arg6: memref<512x128xbf16, #tpu.memory_space<vmem>>, %arg7: memref<1x128xf32, #tpu.memory_space<vmem>>, %arg8: memref<8x128xf32, #tpu.memory_space<vmem>>) attributes {dimension_semantics = [#tpu.dimension_semantics<parallel>], iteration_bounds = array<i64: 1>, scalar_prefetch = 0 : i64, scratch_operands = 0 : i64, tpu.core_type = #tpu.core_type<tc>, window_params = [{transform_indices = @transform_0, window_bounds = array<i64: 8, 12>}, {pipeline_mode = #tpu.pipeline_mode<synchronous>, transform_indices = @transform_1, window_bounds = array<i64: 12, 512>}, {pipeline_mode = #tpu.pipeline_mode<synchronous>, transform_indices = @transform_2, window_bounds = array<i64: 1, 512>}, {pipeline_mode = #tpu.pipeline_mode<synchronous>, transform_indices = @transform_3, window_bounds = array<i64: 512, 512>}, {pipeline_mode = #tpu.pipeline_mode<synchronous>, transform_indices = @transform_4, window_bounds = array<i64: 1, 512>}, {pipeline_mode = #tpu.pipeline_mode<synchronous>, transform_indices = @transform_5, window_bounds = array<i64: 512, 128>}, {pipeline_mode = #tpu.pipeline_mode<synchronous>, transform_indices = @transform_6, window_bounds = array<i64: 1, 128>}, {transform_indices = @transform_7, window_bounds = array<i64: 8, 128>}]} {
    %c0 = arith.constant 0 : index
    %c0_0 = arith.constant 0 : index
    %0 = vector.load %arg1[%c0, %c0_0] : memref<8x12xf32, #tpu.memory_space<vmem>>, vector<8x12xf32>
    %1 = arith.truncf %0 : vector<8x12xf32> to vector<8x12xbf16>
    %c0_1 = arith.constant 0 : index
    %c0_2 = arith.constant 0 : index
    %2 = vector.load %arg2[%c0_1, %c0_2] : memref<12x512xbf16, #tpu.memory_space<vmem>>, vector<12x512xbf16>
    %cst = arith.constant dense<0.000000e+00> : vector<8x512xf32>
    %3 = tpu.matmul %1, %2, %cst {dimension_numbers = #tpu.dot_dimension_numbers<[1], [0], [0], [1], [0, 0, 1, 1], [], []>} : vector<8x12xbf16>, vector<12x512xbf16>, vector<8x512xf32> -> vector<8x512xf32>
    %c0_3 = arith.constant 0 : index
    %c0_4 = arith.constant 0 : index
    %4 = vector.load %arg3[%c0_3, %c0_4] : memref<1x512xf32, #tpu.memory_space<vmem>>, vector<1x512xf32>
    %5 = vector.broadcast %4 : vector<1x512xf32> to vector<8x512xf32>
    %6 = arith.addf %3, %5 : vector<8x512xf32>
    %cst_5 = arith.constant 0.000000e+00 : f32
    %7 = vector.broadcast %cst_5 : f32 to vector<8x512xf32>
    %8 = arith.maximumf %6, %7 : vector<8x512xf32>
    %9 = arith.truncf %8 : vector<8x512xf32> to vector<8x512xbf16>
    %c0_6 = arith.constant 0 : index
    %c0_7 = arith.constant 0 : index
    %10 = vector.load %arg4[%c0_6, %c0_7] : memref<512x512xbf16, #tpu.memory_space<vmem>>, vector<512x512xbf16>
    %cst_8 = arith.constant dense<0.000000e+00> : vector<8x512xf32>
    %11 = tpu.matmul %9, %10, %cst_8 {dimension_numbers = #tpu.dot_dimension_numbers<[1], [0], [0], [1], [0, 0, 1, 1], [], []>} : vector<8x512xbf16>, vector<512x512xbf16>, vector<8x512xf32> -> vector<8x512xf32>
    %c0_9 = arith.constant 0 : index
    %c0_10 = arith.constant 0 : index
    %12 = vector.load %arg5[%c0_9, %c0_10] : memref<1x512xf32, #tpu.memory_space<vmem>>, vector<1x512xf32>
    %13 = vector.broadcast %12 : vector<1x512xf32> to vector<8x512xf32>
    %14 = arith.addf %11, %13 : vector<8x512xf32>
    %cst_11 = arith.constant 0.000000e+00 : f32
    %15 = vector.broadcast %cst_11 : f32 to vector<8x512xf32>
    %16 = arith.maximumf %14, %15 : vector<8x512xf32>
    %17 = arith.truncf %16 : vector<8x512xf32> to vector<8x512xbf16>
    %c0_12 = arith.constant 0 : index
    %c0_13 = arith.constant 0 : index
    %18 = vector.load %arg6[%c0_12, %c0_13] : memref<512x128xbf16, #tpu.memory_space<vmem>>, vector<512x128xbf16>
    %cst_14 = arith.constant dense<0.000000e+00> : vector<8x128xf32>
    %19 = tpu.matmul %17, %18, %cst_14 {dimension_numbers = #tpu.dot_dimension_numbers<[1], [0], [0], [1], [0, 0, 1, 1], [], []>} : vector<8x512xbf16>, vector<512x128xbf16>, vector<8x128xf32> -> vector<8x128xf32>
    %c0_15 = arith.constant 0 : index
    %c0_16 = arith.constant 0 : index
    %20 = vector.load %arg7[%c0_15, %c0_16] : memref<1x128xf32, #tpu.memory_space<vmem>>, vector<1x128xf32>
    %21 = vector.broadcast %20 : vector<1x128xf32> to vector<8x128xf32>
    %22 = arith.addf %19, %21 : vector<8x128xf32>
    %cst_17 = arith.constant 0.000000e+00 : f32
    %23 = vector.broadcast %cst_17 : f32 to vector<8x128xf32>
    %24 = arith.maximumf %22, %23 : vector<8x128xf32>
    %c0_18 = arith.constant 0 : index
    %c0_19 = arith.constant 0 : index
    %25 = vector.load %arg8[%c0_18, %c0_19] : memref<8x128xf32, #tpu.memory_space<vmem>>, vector<8x128xf32>
    tpu.vector_store %arg8[%c0_18, %c0_19], %24 {strides = array<i32>} : memref<8x128xf32, #tpu.memory_space<vmem>>, vector<8x128xf32>,
    return
  }
  func.func @transform_0(%arg0: i32) -> (i32, i32) {
    %c0_i32 = arith.constant 0 : i32
    %c0_i32_0 = arith.constant 0 : i32
    return %arg0, %c0_i32 : i32, i32
  }
  func.func @transform_1(%arg0: i32) -> (i32, i32) {
    %c0_i32 = arith.constant 0 : i32
    %c0_i32_0 = arith.constant 0 : i32
    %c0_i32_1 = arith.constant 0 : i32
    return %c0_i32, %c0_i32_0 : i32, i32
  }
  func.func @transform_2(%arg0: i32) -> (i32, i32) {
    %c0_i32 = arith.constant 0 : i32
    %c0_i32_0 = arith.constant 0 : i32
    %c0_i32_1 = arith.constant 0 : i32
    return %c0_i32, %c0_i32_0 : i32, i32
  }
  func.func @transform_3(%arg0: i32) -> (i32, i32) {
    %c0_i32 = arith.constant 0 : i32
    %c0_i32_0 = arith.constant 0 : i32
    %c0_i32_1 = arith.constant 0 : i32
    return %c0_i32, %c0_i32_0 : i32, i32
  }
  func.func @transform_4(%arg0: i32) -> (i32, i32) {
    %c0_i32 = arith.constant 0 : i32
    %c0_i32_0 = arith.constant 0 : i32
    %c0_i32_1 = arith.constant 0 : i32
    return %c0_i32, %c0_i32_0 : i32, i32
  }
  func.func @transform_5(%arg0: i32) -> (i32, i32) {
    %c0_i32 = arith.constant 0 : i32
    %c0_i32_0 = arith.constant 0 : i32
    %c0_i32_1 = arith.constant 0 : i32
    return %c0_i32, %c0_i32_0 : i32, i32
  }
  func.func @transform_6(%arg0: i32) -> (i32, i32) {
    %c0_i32 = arith.constant 0 : i32
    %c0_i32_0 = arith.constant 0 : i32
    %c0_i32_1 = arith.constant 0 : i32
    return %c0_i32, %c0_i32_0 : i32, i32
  }
  func.func @transform_7(%arg0: i32) -> (i32, i32) {
    %c0_i32 = arith.constant 0 : i32
    %c0_i32_0 = arith.constant 0 : i32
    return %arg0, %c0_i32 : i32, i32
  }
}

</mosaic_0001>

<bundles_post_ra>
// kernel: tpu_custom_call.1
= control target key start
LH: loop header
LB: loop body
LE: loop exit
PB: predicated region body
PF: predicated region fallthrough
CT: control target
= control target key end

     0   :  { %12 = vsyncpa [#allocation3], 0  ;;  %s2295_s0 = inlined_call_operand.hbm [shape: f32[8,12], index: 0, kind: input, shape index: {}]   ;;  %s2296_s1 = inlined_call_operand.hbm [shape: bf16[12,512], index: 1, kind: input, shape index: {}]   ;;  %s2297_s2 = inlined_call_operand.vmem [shape: f32[1,512], index: 2, kind: input, shape index: {}]   ;;  %s2298_s3 = inlined_call_operand.hbm [shape: bf16[512,512], index: 3, kind: input, shape index: {}]   ;;  %s2299_s4 = inlined_call_operand.vmem [shape: f32[1,512], index: 4, kind: input, shape index: {}]   ;;  %s2300_s5 = inlined_call_operand.hbm [shape: bf16[512,128], index: 5, kind: input, shape index: {}]   ;;  %s2301_s6 = inlined_call_operand.vmem [shape: f32[1,128], index: 6, kind: input, shape index: {}]   ;;  %s2302_s7 = inlined_call_operand.hbm [shape: f32[8,128], index: 7, kind: output, shape index: {}]  }
   0x1   :  { %13 = vsyncpa [#allocation6], 0 }
   0x2   :  { %14 = vsyncpa [#allocation9], 0 }
   0x3   :  { %15 = vsyncpa [#allocation4], 0  ;;  %s2139_s24 = smov [#allocation5]   ;;  %s2021_s28 = scalar_lea.hbm %s2296_s1, 512 }
   0x4   :  { %s31_s25 = sshll.u32 %s2139_s24, 4  ;;  %p2022_p0 = scmp.ne.s32.totalorder %s2296_s1, %s2021_s28  ;;  %s32_s25 = int_to_ptr.vmem [resolvable:$true] %s31_s25 }
   0x5   :  { %p2025_p1 = scmp.lt.u32.totalorder %s2021_s28, %s2296_s1 }
   0x7   :  { %p2027_p2 = pnand %p2025_p1, %p2022_p0 }
   0x9   :  { %2030 = shalt.err (!%p2027_p2)
}
   0xa   :  { %s2031_s10 = scalar_lea.vmem %s32_s25, 512  ;;  %p2036_p4 = scmp.lt.s32.totalorder %s32_s25, %s32_s25 }
   0xb   :  { %p2032_p3 = scmp.ne.s32.totalorder %s32_s25, %s2031_s10  ;;  %p2037_p5 = scmp.lt.s32.totalorder %s2031_s10, %s2031_s10 }
   0xd   :  { %p2038_p6 = por %p2037_p5, %p2036_p4 }
   0xf   :  { %p2039_p7 = pnand %p2038_p6, %p2032_p3 }
  0x11   :  { %2042 = shalt.err (!%p2039_p7)
}
  0x12   :  { %s2140_s11 = smov 256   ;;  %s2141_s12 = smov 16  }
  0x13   :  { %37 = dma.hbm_to_vmem [thread:$0]  %s2296_s1, 512, %s32_s25, [#allocation6], %s2140_s11, %s2140_s11, %s2141_s12  }
  0x14   :  { %s2142_s15 = smov [#allocation2]   ;;  %s2143_s17 = smov [#allocation7]  }
  0x15   :  { %s22_s16 = sshll.u32 %s2142_s15, 4  ;;  %s45_s18 = sshll.u32 %s2143_s17, 4  ;;  %s23_s16 = int_to_ptr.vmem [resolvable:$true] %s22_s16  ;;  %s46_s18 = int_to_ptr.vmem [resolvable:$true] %s45_s18 }
  0x16   :  { %s2043_s21 = scalar_lea.hbm %s2295_s0, 128 }
  0x17   :  { %p2044_p8 = scmp.ne.s32.totalorder %s2295_s0, %s2043_s21  ;;  %p2047_p9 = scmp.lt.u32.totalorder %s2043_s21, %s2295_s0 }
  0x19   :  { %p2049_p10 = pnand %p2047_p9, %p2044_p8 }
  0x1b   :  { %2052 = shalt.err (!%p2049_p10)
}
  0x1c   :  { %s2053_s1 = scalar_lea.vmem %s23_s16, 128  ;;  %p2058_p12 = scmp.lt.s32.totalorder %s23_s16, %s23_s16 }
  0x1d   :  { %p2054_p11 = scmp.ne.s32.totalorder %s23_s16, %s2053_s1  ;;  %p2059_p13 = scmp.lt.s32.totalorder %s2053_s1, %s2053_s1 }
  0x1f   :  { %p2060_p0 = por %p2059_p13, %p2058_p12 }
  0x21   :  { %p2061_p1 = pnand %p2060_p0, %p2054_p11 }
  0x23   :  { %2064 = shalt.err (!%p2061_p1)
}
  0x24   :  { %25 = dma.hbm_to_vmem [thread:$0]  %s2295_s0, 128, %s23_s16, [#allocation3]  }
  0x25   :  { %s2065_s30 = scalar_lea.hbm %s2298_s3, 16384 }
  0x26   :  { %p2066_p2 = scmp.ne.s32.totalorder %s2298_s3, %s2065_s30  ;;  %p2069_p3 = scmp.lt.u32.totalorder %s2065_s30, %s2298_s3 }
  0x28   :  { %p2071_p4 = pnand %p2069_p3, %p2066_p2 }
  0x2a   :  { %2074 = shalt.err (!%p2071_p4)
}
  0x2b   :  { %s2075_s14 = scalar_lea.vmem %s46_s18, 16384  ;;  %p2080_p6 = scmp.lt.s32.totalorder %s46_s18, %s46_s18 }
  0x2c   :  { %p2076_p5 = scmp.ne.s32.totalorder %s46_s18, %s2075_s14  ;;  %p2081_p7 = scmp.lt.s32.totalorder %s2075_s14, %s2075_s14 }
  0x2e   :  { %p2082_p8 = por %p2081_p7, %p2080_p6 }
  0x30   :  { %p2083_p9 = pnand %p2082_p8, %p2076_p5 }
  0x32   :  { %2086 = shalt.err (!%p2083_p9)
}
  0x33   :  { %51 = dma.hbm_to_vmem [thread:$0]  %s2298_s3, 16384, %s46_s18, [#allocation6], %s2140_s11, %s2140_s11, %s2141_s12  }
  0x34   :  { %s2144_s16 = smov [#allocation8]   ;;  %s2087_s21 = scalar_lea.hbm %s2300_s5, 4096 }
  0x35   :  { %s59_s17 = sshll.u32 %s2144_s16, 4  ;;  %p2088_p10 = scmp.ne.s32.totalorder %s2300_s5, %s2087_s21  ;;  %s60_s17 = int_to_ptr.vmem [resolvable:$true] %s59_s17 }
  0x36   :  { %p2091_p11 = scmp.lt.u32.totalorder %s2087_s21, %s2300_s5 }
  0x38   :  { %p2093_p12 = pnand %p2091_p11, %p2088_p10 }
  0x3a   :  { %2096 = shalt.err (!%p2093_p12)
}
  0x3b   :  { %s2097_s1 = scalar_lea.vmem %s60_s17, 4096  ;;  %p2102_p0 = scmp.lt.s32.totalorder %s60_s17, %s60_s17 }
  0x3c   :  { %p2098_p13 = scmp.ne.s32.totalorder %s60_s17, %s2097_s1  ;;  %p2103_p1 = scmp.lt.s32.totalorder %s2097_s1, %s2097_s1 }
  0x3e   :  { %p2104_p2 = por %p2103_p1, %p2102_p0 }
  0x40   :  { %p2105_p3 = pnand %p2104_p2, %p2098_p13 }
  0x42   :  { %2108 = shalt.err (!%p2105_p3)
}
  0x43   :  { %s2145_s3 = smov 64   ;;  %s2146_s11 = smov 4  }
  0x44   :  { %65 = dma.hbm_to_vmem [thread:$0]  %s2300_s5, 4096, %s60_s17, [#allocation9], %s2145_s3, %s2145_s3, %s2146_s11  }
  0x45   :  { %2131 = dma.done.wait [#allocation3], 128  }
  0x46   :  { %2132 = vsyncadd [#allocation3], 4294967168 }
  0x47   :  { %2133 = dma.done.wait [#allocation6], 16896  }
  0x48   :  { %2134 = vsyncadd [#allocation6], 4294950400 }
  0x49   :  { %2135 = dma.done.wait [#allocation9], 4096  }
  0x4a   :  { %2136 = vsyncadd [#allocation9], 4294963200  ;;  %v2147_v0 = vmov 0   ;;  %vm129_vm0 = vcmask 1045504   ;;  %v81_v3 = vld [vmem:[#allocation2] sm:$0xff]  ;;  %vm125_vm1 = vcmask 97280  }
  0x4b   :  { %174 = vmatprep.mubr.bf16.mxu0 %v2147_v0  ;;  %215 = vmatprep.mubr.bf16.mxu1 %v2147_v0  ;;  %v1791_v1 = vld [vmem:[#allocation5 + $0x4] ss:$16 sps:$4 sm:$0x3f]   ;;  %v1793_v2 = vld [vmem:[#allocation5] ss:$16 sps:$4 sm:$0x3f]   ;;  %v82_v6 = vpack.c.bf16 %v81_v3, %v81_v3 }
  0x4c   :  { %1560 = vmatprep.subr.msk.bf16.mxu0 %vm129_vm0, %v1791_v1  ;;  %v1794_v4 = vld [vmem:[#allocation5 + $0xc] ss:$16 sps:$4 sm:$0x3f]   ;;  %v131_v5 = vsel %vm129_vm0, %v1793_v2, 0  ;;  %v1797_v8 = vld [vmem:[#allocation7] ss:$16 sps:$4 sm:$0xff]  }
  0x4d   :  { %v1796_v7 = vld [vmem:[#allocation5 + $0x8] ss:$16 sps:$4 sm:$0x3f]   ;;  %143 = vmatpush1.bf16.msra.mxu0 %v131_v5  ;;  %1562 = vmatprep.subr.msk.bf16.mxu1 %vm129_vm0, %v1794_v4  ;;  %v1799_v9 = vld [vmem:[#allocation7 + $0x4] ss:$16 sps:$4 sm:$0xff]   ;;  %s2148_s29 = smov [#allocation10]  }
  0x4e   :  { %v137_v10 = vsel %vm129_vm0, %v1796_v7, 0  ;;  %v1802_v11 = vld [vmem:[#allocation7 + $0xc] ss:$16 sps:$4 sm:$0xff]   ;;  %1022 = vmatprep.subr.bf16.mxu0 %v1799_v9  ;;  %v1800_v12 = vld [vmem:[#allocation7 + $0x8] ss:$16 sps:$4 sm:$0xff]   ;;  %s1545_s30 = sshll.u32 %s2148_s29, 4  ;;  %s1546_s30 = int_to_ptr.vmem [resolvable:$true] %s1545_s30 }
  0x4f   :  { %184 = vmatpush1.bf16.msra.mxu1 %v137_v10  ;;  %v1805_v13 = vld [vmem:[#allocation7 + $0x24] ss:$16 sps:$4 sm:$0xff]   ;;  %v1803_v14 = vld [vmem:[#allocation7 + $0x20] ss:$16 sps:$4 sm:$0xff]   ;;  %v1808_v15 = vld [vmem:[#allocation7 + $0x2c] ss:$16 sps:$4 sm:$0xff]   ;;  %p2114_p5 = scmp.lt.s32.totalorder %s1546_s30, %s1546_s30 }
  0x50   :  { %1561 = vmatmul.mubr.msk.bf16.vlgmr.msra.gmra.mrb[0].mxu0 %vm125_vm1, %v82_v6  ;;  %1104 = vmatprep.subr.bf16.mxu1 %v1802_v11  ;;  %v1811_v16 = vld [vmem:[#allocation7 + $0x44] ss:$16 sps:$4 sm:$0xff]   ;;  %v1806_v17 = vld [vmem:[#allocation7 + $0x28] ss:$16 sps:$4 sm:$0xff]   ;;  %v1814_v18 = vld [vmem:[#allocation7 + $0x4c] ss:$16 sps:$4 sm:$0xff]   ;;  %v89_v11 = vlaneseq }
  0x51   :  { %1023 = vmatpush1.bf16.msra.mxu0 %v1797_v8  ;;  %v1809_v19 = vld [vmem:[#allocation7 + $0x40] ss:$16 sps:$4 sm:$0xff]   ;;  %v1817_v20 = vld [vmem:[#allocation7 + $0x64] ss:$16 sps:$4 sm:$0xff]   ;;  %v1812_v21 = vld [vmem:[#allocation7 + $0x48] ss:$16 sps:$4 sm:$0xff]  }
  0x52   :  { %1563 = vmatmul.mubr.msk.bf16.vlgmr.msra.gmra.mrb[0].mxu1 %vm125_vm1, %v82_v6  ;;  %1024 = vmatprep.subr.bf16.mxu0 %v1805_v13  ;;  %v1820_v22 = vld [vmem:[#allocation7 + $0x6c] ss:$16 sps:$4 sm:$0xff]   ;;  %v1815_v23 = vld [vmem:[#allocation7 + $0x60] ss:$16 sps:$4 sm:$0xff]   ;;  %v1823_v24 = vld [vmem:[#allocation7 + $0x84] ss:$16 sps:$4 sm:$0xff]  }
  0x53   :  { %1105 = vmatpush1.bf16.msra.mxu1 %v1800_v12  ;;  %v1818_v25 = vld [vmem:[#allocation7 + $0x68] ss:$16 sps:$4 sm:$0xff]   ;;  %v1826_v26 = vld [vmem:[#allocation7 + $0x8c] ss:$16 sps:$4 sm:$0xff]   ;;  %v1821_v27 = vld [vmem:[#allocation7 + $0x80] ss:$16 sps:$4 sm:$0xff]  }
  0x54   :  { %1106 = vmatprep.subr.bf16.mxu1 %v1808_v15  ;;  %v1829_v28 = vld [vmem:[#allocation7 + $0xa4] ss:$16 sps:$4 sm:$0xff]   ;;  %v1824_v29 = vld [vmem:[#allocation7 + $0x88] ss:$16 sps:$4 sm:$0xff]   ;;  %v1832_v30 = vld [vmem:[#allocation7 + $0xac] ss:$16 sps:$4 sm:$0xff]  }
  0x55   :  { %1025 = vmatpush1.bf16.msra.mxu0 %v1803_v14  ;;  %v1827_v31 = vld [vmem:[#allocation7 + $0xa0] ss:$16 sps:$4 sm:$0xff]   ;;  %v1835_v32 = vld [vmem:[#allocation7 + $0xc4] ss:$16 sps:$4 sm:$0xff]   ;;  %v1830_v33 = vld [vmem:[#allocation7 + $0xa8] ss:$16 sps:$4 sm:$0xff]  }
  0x56   :  { %1026 = vmatprep.subr.bf16.mxu0 %v1811_v16  ;;  %v1838_v34 = vld [vmem:[#allocation7 + $0xcc] ss:$16 sps:$4 sm:$0xff]   ;;  %v1833_v35 = vld [vmem:[#allocation7 + $0xc0] ss:$16 sps:$4 sm:$0xff]   ;;  %v1841_v36 = vld [vmem:[#allocation7 + $0xe4] ss:$16 sps:$4 sm:$0xff]  }
  0x57   :  { %1107 = vmatpush1.bf16.msra.mxu1 %v1806_v17  ;;  %v1836_v37 = vld [vmem:[#allocation7 + $0xc8] ss:$16 sps:$4 sm:$0xff]   ;;  %v1844_v38 = vld [vmem:[#allocation7 + $0xec] ss:$16 sps:$4 sm:$0xff]   ;;  %v1839_v39 = vld [vmem:[#allocation7 + $0xe0] ss:$16 sps:$4 sm:$0xff]  }
  0x58   :  { %1108 = vmatprep.subr.bf16.mxu1 %v1814_v18  ;;  %v1847_v40 = vld [vmem:[#allocation7 + $0x104] ss:$16 sps:$4 sm:$0xff]   ;;  %v1842_v41 = vld [vmem:[#allocation7 + $0xe8] ss:$16 sps:$4 sm:$0xff]   ;;  %v1850_v42 = vld [vmem:[#allocation7 + $0x10c] ss:$16 sps:$4 sm:$0xff]  }
  0x59   :  { %1027 = vmatpush1.bf16.msra.mxu0 %v1809_v19  ;;  %v1845_v43 = vld [vmem:[#allocation7 + $0x100] ss:$16 sps:$4 sm:$0xff]   ;;  %v1853_v44 = vld [vmem:[#allocation7 + $0x124] ss:$16 sps:$4 sm:$0xff]   ;;  %v1848_v45 = vld [vmem:[#allocation7 + $0x108] ss:$16 sps:$4 sm:$0xff]  }
  0x5a   :  { %1028 = vmatprep.subr.bf16.mxu0 %v1817_v20  ;;  %v1851_v46 = vld [vmem:[#allocation7 + $0x120] ss:$16 sps:$4 sm:$0xff]   ;;  %v1856_v47 = vld [vmem:[#allocation7 + $0x12c] ss:$16 sps:$4 sm:$0xff]   ;;  %v1854_v48 = vld [vmem:[#allocation7 + $0x128] ss:$16 sps:$4 sm:$0xff]  }
  0x5b   :  { %1109 = vmatpush1.bf16.msra.mxu1 %v1812_v21  ;;  %v1859_v49 = vld [vmem:[#allocation7 + $0x144] ss:$16 sps:$4 sm:$0xff]   ;;  %v1862_v50 = vld [vmem:[#allocation7 + $0x14c] ss:$16 sps:$4 sm:$0xff]   ;;  %v1857_v51 = vld [vmem:[#allocation7 + $0x140] ss:$16 sps:$4 sm:$0xff]  }
  0x5c   :  { %1110 = vmatprep.subr.bf16.mxu1 %v1820_v22  ;;  %v1865_v52 = vld [vmem:[#allocation7 + $0x164] ss:$16 sps:$4 sm:$0xff]   ;;  %v1860_v53 = vld [vmem:[#allocation7 + $0x148] ss:$16 sps:$4 sm:$0xff]   ;;  %v1868_v54 = vld [vmem:[#allocation7 + $0x16c] ss:$16 sps:$4 sm:$0xff]  }
  0x5d   :  { %1029 = vmatpush1.bf16.msra.mxu0 %v1815_v23  ;;  %v1863_v55 = vld [vmem:[#allocation7 + $0x160] ss:$16 sps:$4 sm:$0xff]   ;;  %v1871_v56 = vld [vmem:[#allocation7 + $0x184] ss:$16 sps:$4 sm:$0xff]   ;;  %v1866_v57 = vld [vmem:[#allocation7 + $0x168] ss:$16 sps:$4 sm:$0xff]  }
  0x5e   :  { %1030 = vmatprep.subr.bf16.mxu0 %v1823_v24  ;;  %v1874_v58 = vld [vmem:[#allocation7 + $0x18c] ss:$16 sps:$4 sm:$0xff]   ;;  %v1869_v59 = vld [vmem:[#allocation7 + $0x180] ss:$16 sps:$4 sm:$0xff]   ;;  %v1877_v60 = vld [vmem:[#allocation7 + $0x1a4] ss:$16 sps:$4 sm:$0xff]  }
  0x5f   :  { %1111 = vmatpush1.bf16.msra.mxu1 %v1818_v25  ;;  %v1872_v61 = vld [vmem:[#allocation7 + $0x188] ss:$16 sps:$4 sm:$0xff]   ;;  %v1880_v62 = vld [vmem:[#allocation7 + $0x1ac] ss:$16 sps:$4 sm:$0xff]   ;;  %v1875_v63 = vld [vmem:[#allocation7 + $0x1a0] ss:$16 sps:$4 sm:$0xff]  }
  0x60   :  { %1112 = vmatprep.subr.bf16.mxu1 %v1826_v26  ;;  %v1878_v0 = vld [vmem:[#allocation7 + $0x1a8] ss:$16 sps:$4 sm:$0xff]   ;;  %v1883_v1 = vld [vmem:[#allocation7 + $0x1c4] ss:$16 sps:$4 sm:$0xff]   ;;  %v1886_v2 = vld [vmem:[#allocation7 + $0x1cc] ss:$16 sps:$4 sm:$0xff]  }
  0x61   :  { %1031 = vmatpush1.bf16.msra.mxu0 %v1821_v27  ;;  %v1881_v3 = vld [vmem:[#allocation7 + $0x1c0] ss:$16 sps:$4 sm:$0xff]   ;;  %v1884_v4 = vld [vmem:[#allocation7 + $0x1c8] ss:$16 sps:$4 sm:$0xff]   ;;  %v1889_v5 = vld [vmem:[#allocation7 + $0x1e4] ss:$16 sps:$4 sm:$0xff]  }
  0x62   :  { %1032 = vmatprep.subr.bf16.mxu0 %v1829_v28  ;;  %v1892_v6 = vld [vmem:[#allocation7 + $0x1ec] ss:$16 sps:$4 sm:$0xff]   ;;  %v1887_v7 = vld [vmem:[#allocation7 + $0x1e0] ss:$16 sps:$4 sm:$0xff]   ;;  %v1890_v8 = vld [vmem:[#allocation7 + $0x1e8] ss:$16 sps:$4 sm:$0xff]  }
  0x63   :  { %1113 = vmatpush1.bf16.msra.mxu1 %v1824_v29  ;;  %v1895_v9 = vld [vmem:[#allocation7 + $0x204] ss:$16 sps:$4 sm:$0xff]   ;;  %v1898_v10 = vld [vmem:[#allocation7 + $0x20c] ss:$16 sps:$4 sm:$0xff]   ;;  %v2243_v12 = vshrl.u32 %v89_v11, 7  ;;  %s2109_s8 = scalar_lea.vmem %s1546_s30, 128 }
  0x64   :  { %1114 = vmatprep.subr.bf16.mxu1 %v1832_v30  ;;  %v2249_v14 = vld [vmem:[%s2297_s2] sm:$0xf]  ;;  %v1955_v11 = vld [vmem:[#allocation7 + $0x344] ss:$16 sps:$4 sm:$0xff]   ;;  %p2110_p4 = scmp.ne.s32.totalorder %s1546_s30, %s2109_s8  ;;  %p2115_p6 = scmp.lt.s32.totalorder %s2109_s8, %s2109_s8 }
  0x65   :  { %1033 = vmatpush1.bf16.msra.mxu0 %v1827_v31  ;;  %v91_v13 = vsub.s32 0, %v2243_v12  ;;  %v95_v15 = vsub.s32 1, %v2243_v12  ;;  %v103_v16 = vsub.s32 3, %v2243_v12 }
  0x66   :  { %1034 = vmatprep.subr.bf16.mxu0 %v1835_v32  ;;  %p2116_p7 = por %p2115_p6, %p2114_p5 }
  0x67   :  { %1115 = vmatpush1.bf16.msra.mxu1 %v1830_v33  ;;  %v92_v17 = vrot.slane %v2249_v14, %v91_v13  ;;  %v96_v18 = vrot.slane %v2249_v14, %v95_v15  ;;  %v104_v20 = vrot.slane %v2249_v14, %v103_v16 }
  0x68   :  { %1116 = vmatprep.subr.bf16.mxu1 %v1838_v34  ;;  %v1893_v34 = vld [vmem:[#allocation7 + $0x200] ss:$16 sps:$4 sm:$0xff]   ;;  %p2117_p8 = pnand %p2116_p7, %p2110_p4 }
  0x69   :  { %1035 = vmatpush1.bf16.msra.mxu0 %v1833_v35  ;;  %v1896_v35 = vld [vmem:[#allocation7 + $0x208] ss:$16 sps:$4 sm:$0xff]  }
  0x6a   :  { %1036 = vmatprep.subr.bf16.mxu0 %v1841_v36 }
  0x6b   :  { %1117 = vmatpush1.bf16.msra.mxu1 %v1836_v37 }
  0x6c   :  { %1118 = vmatprep.subr.bf16.mxu1 %v1844_v38  ;;  %v1901_v38 = vld [vmem:[#allocation7 + $0x224] ss:$16 sps:$4 sm:$0xff]  }
  0x6d   :  { %1037 = vmatpush1.bf16.msra.mxu0 %v1839_v39  ;;  %v1904_v39 = vld [vmem:[#allocation7 + $0x22c] ss:$16 sps:$4 sm:$0xff]  }
  0x6e   :  { %1038 = vmatprep.subr.bf16.mxu0 %v1847_v40 }
  0x6f   :  { %1119 = vmatpush1.bf16.msra.mxu1 %v1842_v41  ;;  %v1899_v41 = vld [vmem:[#allocation7 + $0x220] ss:$16 sps:$4 sm:$0xff]  }
  0x70   :  { %1120 = vmatprep.subr.bf16.mxu1 %v1850_v42  ;;  %v1902_v42 = vld [vmem:[#allocation7 + $0x228] ss:$16 sps:$4 sm:$0xff]  }
  0x71   :  { %1039 = vmatpush1.bf16.msra.mxu0 %v1845_v43  ;;  %v1907_v43 = vld [vmem:[#allocation7 + $0x244] ss:$16 sps:$4 sm:$0xff]  }
  0x72   :  { %1040 = vmatprep.subr.bf16.mxu0 %v1853_v44  ;;  %v1910_v44 = vld [vmem:[#allocation7 + $0x24c] ss:$16 sps:$4 sm:$0xff]  }
  0x73   :  { %1121 = vmatpush1.bf16.msra.mxu1 %v1848_v45  ;;  %v1905_v45 = vld [vmem:[#allocation7 + $0x240] ss:$16 sps:$4 sm:$0xff]  }
  0x74   :  { %1122 = vmatprep.subr.bf16.mxu1 %v1856_v47  ;;  %v1913_v47 = vld [vmem:[#allocation7 + $0x264] ss:$16 sps:$4 sm:$0xff]  }
  0x75   :  { %1041 = vmatpush1.bf16.msra.mxu0 %v1851_v46  ;;  %v1908_v46 = vld [vmem:[#allocation7 + $0x248] ss:$16 sps:$4 sm:$0xff]  }
  0x76   :  { %1042 = vmatprep.subr.bf16.mxu0 %v1859_v49  ;;  %v1911_v49 = vld [vmem:[#allocation7 + $0x260] ss:$16 sps:$4 sm:$0xff]  }
  0x77   :  { %1123 = vmatpush1.bf16.msra.mxu1 %v1854_v48  ;;  %v1916_v48 = vld [vmem:[#allocation7 + $0x26c] ss:$16 sps:$4 sm:$0xff]  }
  0x78   :  { %1124 = vmatprep.subr.bf16.mxu1 %v1862_v50  ;;  %v1914_v50 = vld [vmem:[#allocation7 + $0x268] ss:$16 sps:$4 sm:$0xff]  }
  0x79   :  { %1043 = vmatpush1.bf16.msra.mxu0 %v1857_v51  ;;  %v1919_v51 = vld [vmem:[#allocation7 + $0x284] ss:$16 sps:$4 sm:$0xff]  }
  0x7a   :  { %1044 = vmatprep.subr.bf16.mxu0 %v1865_v52  ;;  %v1922_v52 = vld [vmem:[#allocation7 + $0x28c] ss:$16 sps:$4 sm:$0xff]  }
  0x7b   :  { %1125 = vmatpush1.bf16.msra.mxu1 %v1860_v53  ;;  %v1917_v53 = vld [vmem:[#allocation7 + $0x280] ss:$16 sps:$4 sm:$0xff]  }
  0x7c   :  { %1126 = vmatprep.subr.bf16.mxu1 %v1868_v54  ;;  %v1920_v54 = vld [vmem:[#allocation7 + $0x288] ss:$16 sps:$4 sm:$0xff]  }
  0x7d   :  { %1045 = vmatpush1.bf16.msra.mxu0 %v1863_v55  ;;  %v1925_v55 = vld [vmem:[#allocation7 + $0x2a4] ss:$16 sps:$4 sm:$0xff]  }
  0x7e   :  { %1046 = vmatprep.subr.bf16.mxu0 %v1871_v56  ;;  %v1928_v56 = vld [vmem:[#allocation7 + $0x2ac] ss:$16 sps:$4 sm:$0xff]  }
  0x7f   :  { %1127 = vmatpush1.bf16.msra.mxu1 %v1866_v57  ;;  %v1923_v57 = vld [vmem:[#allocation7 + $0x2a0] ss:$16 sps:$4 sm:$0xff]  }
  0x80   :  { %1128 = vmatprep.subr.bf16.mxu1 %v1874_v58  ;;  %v1926_v58 = vld [vmem:[#allocation7 + $0x2a8] ss:$16 sps:$4 sm:$0xff]  }
  0x81   :  { %1047 = vmatpush1.bf16.msra.mxu0 %v1869_v59  ;;  %v1931_v59 = vld [vmem:[#allocation7 + $0x2c4] ss:$16 sps:$4 sm:$0xff]  }
  0x82   :  { %1048 = vmatprep.subr.bf16.mxu0 %v1877_v60  ;;  %v1934_v60 = vld [vmem:[#allocation7 + $0x2cc] ss:$16 sps:$4 sm:$0xff]  }
  0x83   :  { %1129 = vmatpush1.bf16.msra.mxu1 %v1872_v61  ;;  %v1929_v61 = vld [vmem:[#allocation7 + $0x2c0] ss:$16 sps:$4 sm:$0xff]  }
  0x84   :  { %1130 = vmatprep.subr.bf16.mxu1 %v1880_v62  ;;  %v1932_v62 = vld [vmem:[#allocation7 + $0x2c8] ss:$16 sps:$4 sm:$0xff]  }
  0x85   :  { %1049 = vmatpush1.bf16.msra.mxu0 %v1875_v63  ;;  %v1937_v63 = vld [vmem:[#allocation7 + $0x2e4] ss:$16 sps:$4 sm:$0xff]  }
  0x86   :  { %1050 = vmatprep.subr.bf16.mxu0 %v1883_v1  ;;  %v1935_v1 = vld [vmem:[#allocation7 + $0x2e0] ss:$16 sps:$4 sm:$0xff]  }
  0x87   :  { %1131 = vmatpush1.bf16.msra.mxu1 %v1878_v0  ;;  %v1940_v0 = vld [vmem:[#allocation7 + $0x2ec] ss:$16 sps:$4 sm:$0xff]  }
  0x88   :  { %1132 = vmatprep.subr.bf16.mxu1 %v1886_v2  ;;  %v1938_v2 = vld [vmem:[#allocation7 + $0x2e8] ss:$16 sps:$4 sm:$0xff]  }
  0x89   :  { %1051 = vmatpush1.bf16.msra.mxu0 %v1881_v3  ;;  %v1943_v3 = vld [vmem:[#allocation7 + $0x304] ss:$16 sps:$4 sm:$0xff]  }
  0x8a   :  { %1052 = vmatprep.subr.bf16.mxu0 %v1889_v5  ;;  %v1941_v5 = vld [vmem:[#allocation7 + $0x300] ss:$16 sps:$4 sm:$0xff]  }
  0x8b   :  { %1133 = vmatpush1.bf16.msra.mxu1 %v1884_v4  ;;  %v1946_v4 = vld [vmem:[#allocation7 + $0x30c] ss:$16 sps:$4 sm:$0xff]  }
  0x8c   :  { %1134 = vmatprep.subr.bf16.mxu1 %v1892_v6  ;;  %v1944_v6 = vld [vmem:[#allocation7 + $0x308] ss:$16 sps:$4 sm:$0xff]  }
  0x8d   :  { %1053 = vmatpush1.bf16.msra.mxu0 %v1887_v7  ;;  %v1949_v7 = vld [vmem:[#allocation7 + $0x324] ss:$16 sps:$4 sm:$0xff]  }
  0x8e   :  { %1063 = vmatprep.subr.bf16.mxu0 %v1895_v9  ;;  %v1947_v9 = vld [vmem:[#allocation7 + $0x320] ss:$16 sps:$4 sm:$0xff]  }
  0x8f   :  { %1135 = vmatpush1.bf16.msra.mxu1 %v1890_v8  ;;  %v1952_v8 = vld [vmem:[#allocation7 + $0x32c] ss:$16 sps:$4 sm:$0xff]  }
  0x90   :  { %1145 = vmatprep.subr.bf16.mxu1 %v1898_v10  ;;  %v1950_v10 = vld [vmem:[#allocation7 + $0x328] ss:$16 sps:$4 sm:$0xff]  }
 0x123   :  { %v176_v19 = vpop.f32.mrb[0].mxu0 }
 0x124   :  { %v177_v21 = vadd.f32 %v176_v19, %v92_v17  ;;  %v178_v22 = vpop.f32.mrb[1].mxu0  ;;  %v1958_v17 = vld [vmem:[#allocation7 + $0x34c] ss:$16 sps:$4 sm:$0xff]   ;;  %v1956_v19 = vld [vmem:[#allocation7 + $0x348] ss:$16 sps:$4 sm:$0xff]  }
 0x125   :  { %v179_v23 = vadd.f32 %v178_v22, %v96_v18  ;;  %v180_v24 = vpop.f32.mrb[2].mxu0  ;;  %v2262_v25 = vpop.f32.mrb[0].mxu1  ;;  %v1953_v18 = vld [vmem:[#allocation7 + $0x340] ss:$16 sps:$4 sm:$0xff]  }
 0x126   :  { %v224_v26 = vmax.f32 %v177_v21, 0.0  ;;  %v181_v27 = vpop.f32.mrb[3].mxu0  ;;  %v219_v28 = vpop.f32.mrb[1].mxu1  ;;  %v1964_v21 = vld [vmem:[#allocation7 + $0x36c] ss:$16 sps:$4 sm:$0xff]  }
 0x127   :  { %v225_v29 = vmax.f32 %v179_v23, 0.0  ;;  %v220_v30 = vadd.f32 %v219_v28, %v104_v20  ;;  %v221_v31 = vpop.f32.mrb[2].mxu1  ;;  %v1961_v20 = vld [vmem:[#allocation7 + $0x364] ss:$16 sps:$4 sm:$0xff]   ;;  %v1959_v22 = vld [vmem:[#allocation7 + $0x360] ss:$16 sps:$4 sm:$0xff]  }
 0x128   :  { %v222_v32 = vpop.f32.mrb[3].mxu1  ;;  %v228_v37 = vpack.c.bf16 %v224_v26, %v224_v26  ;;  %v1962_v23 = vld [vmem:[#allocation7 + $0x368] ss:$16 sps:$4 sm:$0xff]   ;;  %v1967_v24 = vld [vmem:[#allocation7 + $0x384] ss:$16 sps:$4 sm:$0xff]  }
 0x129   :  { %v229_v33 = vpack.c.bf16 %v225_v29, %v225_v29  ;;  %v227_v36 = vmax.f32 %v220_v30, 0.0  ;;  %v1970_v26 = vld [vmem:[#allocation7 + $0x38c] ss:$16 sps:$4 sm:$0xff]   ;;  %v1965_v27 = vld [vmem:[#allocation7 + $0x380] ss:$16 sps:$4 sm:$0xff]   ;;  %v99_v29 = vsub.s32 2, %v2243_v12 }
 0x12a   :  { %v1968_v28 = vld [vmem:[#allocation7 + $0x388] ss:$16 sps:$4 sm:$0xff]   ;;  %v1973_v30 = vld [vmem:[#allocation7 + $0x3a4] ss:$16 sps:$4 sm:$0xff]   ;;  %v1976_v31 = vld [vmem:[#allocation7 + $0x3ac] ss:$16 sps:$4 sm:$0xff]  }
 0x12b   :  { %1054 = vmatprep.mubr.bf16.mxu0 %v229_v33  ;;  %1136 = vmatprep.mubr.bf16.mxu1 %v229_v33  ;;  %v231_v40 = vpack.c.bf16 %v227_v36, %v227_v36  ;;  %v1971_v32 = vld [vmem:[#allocation7 + $0x3a0] ss:$16 sps:$4 sm:$0xff]   ;;  %v1974_v33 = vld [vmem:[#allocation7 + $0x3a8] ss:$16 sps:$4 sm:$0xff]   ;;  %v1982_v36 = vld [vmem:[#allocation7 + $0x3cc] ss:$16 sps:$4 sm:$0xff]  }
 0x12c   :  { %1055 = vmatmul.mubr.bf16.vlgmr.msra.gmra.mrb[4].mxu0 %v228_v37  ;;  %1137 = vmatmul.mubr.bf16.vlgmr.msra.gmra.mrb[4].mxu1 %v228_v37  ;;  %v1977_v37 = vld [vmem:[#allocation7 + $0x3c0] ss:$16 sps:$4 sm:$0xff]  }
 0x12d   :  { %1064 = vmatpush1.bf16.msra.mxu0 %v1893_v34  ;;  %1146 = vmatpush1.bf16.msra.mxu1 %v1896_v35  ;;  %v100_v34 = vrot.slane %v2249_v14, %v99_v29  ;;  %v1979_v35 = vld [vmem:[#allocation7 + $0x3c4] ss:$16 sps:$4 sm:$0xff]  }
 0x12e   :  { %1065 = vmatprep.subr.bf16.mxu0 %v1901_v38  ;;  %1147 = vmatprep.subr.bf16.mxu1 %v1904_v39  ;;  %v1980_v38 = vld [vmem:[#allocation7 + $0x3c8] ss:$16 sps:$4 sm:$0xff]   ;;  %v1989_v14 = vld [vmem:[#allocation8 + $0x40] sm:$0xff]  }
 0x12f   :  { %1095 = vmatprep.mubr.bf16.mxu0 %v231_v40  ;;  %1177 = vmatprep.mubr.bf16.mxu1 %v231_v40  ;;  %v218_v39 = vadd.f32 %v2262_v25, %v100_v34  ;;  %v1985_v40 = vld [vmem:[#allocation7 + $0x3e4] ss:$16 sps:$4 sm:$0xff]   ;;  %v1993_v25 = vld [vmem:[#allocation8 + $0x48] sm:$0xff]  }
 0x131   :  { %1066 = vmatpush1.bf16.msra.mxu0 %v1899_v41  ;;  %1148 = vmatpush1.bf16.msra.mxu1 %v1902_v42  ;;  %v1988_v41 = vld [vmem:[#allocation7 + $0x3ec] ss:$16 sps:$4 sm:$0xff]   ;;  %v1983_v42 = vld [vmem:[#allocation7 + $0x3e0] ss:$16 sps:$4 sm:$0xff]  }
 0x132   :  { %1067 = vmatprep.subr.bf16.mxu0 %v1907_v43  ;;  %1149 = vmatprep.subr.bf16.mxu1 %v1910_v44  ;;  %v1986_v43 = vld [vmem:[#allocation7 + $0x3e8] ss:$16 sps:$4 sm:$0xff]   ;;  %v226_v44 = vmax.f32 %v218_v39, 0.0 }
 0x135   :  { %1068 = vmatpush1.bf16.msra.mxu0 %v1905_v45  ;;  %1150 = vmatpush1.bf16.msra.mxu1 %v1908_v46  ;;  %v1990_v45 = vld [vmem:[#allocation8 + $0xc0] sm:$0xff]  }
 0x136   :  { %1069 = vmatprep.subr.bf16.mxu0 %v1913_v47  ;;  %1151 = vmatprep.subr.bf16.mxu1 %v1916_v48  ;;  %v1991_v46 = vld [vmem:[#allocation8] sm:$0xff]   ;;  %v230_v48 = vpack.c.bf16 %v226_v44, %v226_v44 }
 0x137   :  { %v1992_v47 = vld [vmem:[#allocation8 + $0x80] sm:$0xff]  }
 0x139   :  { %1070 = vmatpush1.bf16.msra.mxu0 %v1911_v49  ;;  %1152 = vmatpush1.bf16.msra.mxu1 %v1914_v50  ;;  %v1994_v49 = vld [vmem:[#allocation8 + $0xc8] sm:$0xff]  }
 0x13a   :  { %1071 = vmatprep.subr.bf16.mxu0 %v1919_v51  ;;  %1153 = vmatprep.subr.bf16.mxu1 %v1922_v52  ;;  %v1995_v50 = vld [vmem:[#allocation8 + $0x8] sm:$0xff]   ;;  %v1997_v52 = vld [vmem:[#allocation8 + $0x50] sm:$0xff]  }
 0x13b   :  { %v1996_v51 = vld [vmem:[#allocation8 + $0x88] sm:$0xff]  }
 0x13d   :  { %1072 = vmatpush1.bf16.msra.mxu0 %v1917_v53  ;;  %1154 = vmatpush1.bf16.msra.mxu1 %v1920_v54  ;;  %v1998_v53 = vld [vmem:[#allocation8 + $0xd0] sm:$0xff]  }
 0x13e   :  { %1073 = vmatprep.subr.bf16.mxu0 %v1925_v55  ;;  %1155 = vmatprep.subr.bf16.mxu1 %v1928_v56  ;;  %v1999_v54 = vld [vmem:[#allocation8 + $0x10] sm:$0xff]   ;;  %v2001_v56 = vld [vmem:[#allocation8 + $0x58] sm:$0xff]  }
 0x13f   :  { %v2000_v55 = vld [vmem:[#allocation8 + $0x90] sm:$0xff]  }
 0x141   :  { %1074 = vmatpush1.bf16.msra.mxu0 %v1923_v57  ;;  %1156 = vmatpush1.bf16.msra.mxu1 %v1926_v58  ;;  %v2002_v57 = vld [vmem:[#allocation8 + $0xd8] sm:$0xff]  }
 0x142   :  { %1075 = vmatprep.subr.bf16.mxu0 %v1931_v59  ;;  %1157 = vmatprep.subr.bf16.mxu1 %v1934_v60  ;;  %v2003_v58 = vld [vmem:[#allocation8 + $0x18] sm:$0xff]   ;;  %v2005_v60 = vld [vmem:[#allocation8 + $0x60] sm:$0xff]  }
 0x143   :  { %v2004_v59 = vld [vmem:[#allocation8 + $0x98] sm:$0xff]  }
 0x145   :  { %1076 = vmatpush1.bf16.msra.mxu0 %v1929_v61  ;;  %1158 = vmatpush1.bf16.msra.mxu1 %v1932_v62  ;;  %v2006_v61 = vld [vmem:[#allocation8 + $0xe0] sm:$0xff]  }
 0x146   :  { %1077 = vmatprep.subr.bf16.mxu0 %v1937_v63  ;;  %1159 = vmatprep.subr.bf16.mxu1 %v1940_v0  ;;  %v2007_v62 = vld [vmem:[#allocation8 + $0x20] sm:$0xff]   ;;  %v2009_v0 = vld [vmem:[#allocation8 + $0x68] sm:$0xff]  }
 0x147   :  { %v2008_v63 = vld [vmem:[#allocation8 + $0xa0] sm:$0xff]  }
 0x149   :  { %1078 = vmatpush1.bf16.msra.mxu0 %v1935_v1  ;;  %1160 = vmatpush1.bf16.msra.mxu1 %v1938_v2  ;;  %v2010_v1 = vld [vmem:[#allocation8 + $0xe8] sm:$0xff]  }
 0x14a   :  { %1079 = vmatprep.subr.bf16.mxu0 %v1943_v3  ;;  %1161 = vmatprep.subr.bf16.mxu1 %v1946_v4  ;;  %v2011_v2 = vld [vmem:[#allocation8 + $0x28] sm:$0xff]   ;;  %v2013_v4 = vld [vmem:[#allocation8 + $0x70] sm:$0xff]  }
 0x14b   :  { %v2012_v3 = vld [vmem:[#allocation8 + $0xa8] sm:$0xff]  }
 0x14d   :  { %1080 = vmatpush1.bf16.msra.mxu0 %v1941_v5  ;;  %1162 = vmatpush1.bf16.msra.mxu1 %v1944_v6  ;;  %v2014_v5 = vld [vmem:[#allocation8 + $0xf0] sm:$0xff]  }
 0x14e   :  { %1081 = vmatprep.subr.bf16.mxu0 %v1949_v7  ;;  %1163 = vmatprep.subr.bf16.mxu1 %v1952_v8  ;;  %v2015_v6 = vld [vmem:[#allocation8 + $0x30] sm:$0xff]   ;;  %v2017_v8 = vld [vmem:[#allocation8 + $0x78] sm:$0xff]  }
 0x14f   :  { %v2016_v7 = vld [vmem:[#allocation8 + $0xb0] sm:$0xff]  }
 0x151   :  { %1082 = vmatpush1.bf16.msra.mxu0 %v1947_v9  ;;  %1164 = vmatpush1.bf16.msra.mxu1 %v1950_v10  ;;  %v2018_v9 = vld [vmem:[#allocation8 + $0xf8] sm:$0xff]  }
 0x152   :  { %1083 = vmatprep.subr.bf16.mxu0 %v1955_v11  ;;  %1165 = vmatprep.subr.bf16.mxu1 %v1958_v17  ;;  %v2019_v10 = vld [vmem:[#allocation8 + $0x38] sm:$0xff]  }
 0x153   :  { %v2020_v11 = vld [vmem:[#allocation8 + $0xb8] sm:$0xff]  }
 0x154   :  { %v360_v17 = vld [vmem:[%s2299_s4] sm:$0xf] }
 0x155   :  { %1084 = vmatpush1.bf16.msra.mxu0 %v1953_v18  ;;  %1166 = vmatpush1.bf16.msra.mxu1 %v1956_v19  ;;  %v365_v18 = vrot.slane %v360_v17, %v91_v13  ;;  %v373_v19 = vrot.slane %v360_v17, %v99_v29 }
 0x156   :  { %1085 = vmatprep.subr.bf16.mxu0 %v1961_v20  ;;  %1167 = vmatprep.subr.bf16.mxu1 %v1964_v21  ;;  %v369_v20 = vrot.slane %v360_v17, %v95_v15  ;;  %v377_v21 = vrot.slane %v360_v17, %v103_v16 }
 0x159   :  { %1086 = vmatpush1.bf16.msra.mxu0 %v1959_v22  ;;  %1168 = vmatpush1.bf16.msra.mxu1 %v1962_v23 }
 0x15a   :  { %1087 = vmatprep.subr.bf16.mxu0 %v1967_v24  ;;  %1169 = vmatprep.subr.bf16.mxu1 %v1970_v26 }
 0x15d   :  { %1088 = vmatpush1.bf16.msra.mxu0 %v1965_v27  ;;  %1170 = vmatpush1.bf16.msra.mxu1 %v1968_v28 }
 0x15e   :  { %1089 = vmatprep.subr.bf16.mxu0 %v1973_v30  ;;  %1171 = vmatprep.subr.bf16.mxu1 %v1976_v31 }
 0x161   :  { %1090 = vmatpush1.bf16.msra.mxu0 %v1971_v32  ;;  %1172 = vmatpush1.bf16.msra.mxu1 %v1974_v33 }
 0x162   :  { %1091 = vmatprep.subr.bf16.mxu0 %v1979_v35  ;;  %1173 = vmatprep.subr.bf16.mxu1 %v1982_v36 }
 0x165   :  { %1092 = vmatpush1.bf16.msra.mxu0 %v1977_v37  ;;  %1174 = vmatpush1.bf16.msra.mxu1 %v1980_v38 }
 0x166   :  { %1093 = vmatprep.subr.bf16.mxu0 %v1985_v40  ;;  %1175 = vmatprep.subr.bf16.mxu1 %v1988_v41  ;;  %v1692_v41 = vld [vmem:[%s2301_s6] ss:$0 sm:$0xff] }
 0x169   :  { %1094 = vmatpush1.bf16.msra.mxu0 %v1983_v42  ;;  %1176 = vmatpush1.bf16.msra.mxu1 %v1986_v43 }
 0x16a   :  { %1725 = vmatprep.subr.bf16.mxu0 %v1989_v14  ;;  %1747 = vmatprep.subr.bf16.mxu1 %v1990_v45 }
 0x16c   :  { %1096 = vmatmul.mubr.bf16.vlgmr.msra.gmra.mrb[4].mxu0 %v230_v48  ;;  %1178 = vmatmul.mubr.bf16.vlgmr.msra.gmra.mrb[4].mxu1 %v230_v48 }
 0x16d   :  { %1726 = vmatpush3.bf16.msra.mxu0 %v1991_v46  ;;  %1748 = vmatpush3.bf16.msra.mxu1 %v1992_v47 }
 0x16e   :  { %1727 = vmatprep.subr.bf16.mxu0 %v1993_v25  ;;  %1749 = vmatprep.subr.bf16.mxu1 %v1994_v49 }
 0x171   :  { %1728 = vmatpush3.bf16.msra.mxu0 %v1995_v50  ;;  %1750 = vmatpush3.bf16.msra.mxu1 %v1996_v51 }
 0x172   :  { %1729 = vmatprep.subr.bf16.mxu0 %v1997_v52  ;;  %1751 = vmatprep.subr.bf16.mxu1 %v1998_v53 }
 0x175   :  { %1730 = vmatpush3.bf16.msra.mxu0 %v1999_v54  ;;  %1752 = vmatpush3.bf16.msra.mxu1 %v2000_v55 }
 0x176   :  { %1731 = vmatprep.subr.bf16.mxu0 %v2001_v56  ;;  %1753 = vmatprep.subr.bf16.mxu1 %v2002_v57 }
 0x179   :  { %1732 = vmatpush3.bf16.msra.mxu0 %v2003_v58  ;;  %1754 = vmatpush3.bf16.msra.mxu1 %v2004_v59 }
 0x17a   :  { %1733 = vmatprep.subr.bf16.mxu0 %v2005_v60  ;;  %1755 = vmatprep.subr.bf16.mxu1 %v2006_v61 }
 0x17d   :  { %1734 = vmatpush3.bf16.msra.mxu0 %v2007_v62  ;;  %1756 = vmatpush3.bf16.msra.mxu1 %v2008_v63 }
 0x17e   :  { %1735 = vmatprep.subr.bf16.mxu0 %v2009_v0  ;;  %1757 = vmatprep.subr.bf16.mxu1 %v2010_v1 }
 0x181   :  { %1736 = vmatpush3.bf16.msra.mxu0 %v2011_v2  ;;  %1758 = vmatpush3.bf16.msra.mxu1 %v2012_v3 }
 0x182   :  { %1737 = vmatprep.subr.bf16.mxu0 %v2013_v4  ;;  %1759 = vmatprep.subr.bf16.mxu1 %v2014_v5 }
 0x185   :  { %1738 = vmatpush3.bf16.msra.mxu0 %v2015_v6  ;;  %1760 = vmatpush3.bf16.msra.mxu1 %v2016_v7 }
 0x186   :  { %1739 = vmatprep.subr.bf16.mxu0 %v2017_v8  ;;  %1761 = vmatprep.subr.bf16.mxu1 %v2018_v9 }
 0x189   :  { %1740 = vmatpush3.bf16.msra.mxu0 %v2019_v10  ;;  %1762 = vmatpush3.bf16.msra.mxu1 %v2020_v11 }
 0x23f   :  { %v1097_v22 = vpop.f32.mrb[4].mxu0  ;;  %v1179_v23 = vpop.f32.mrb[4].mxu1 }
 0x240   :  { %v1769_v24 = vadd.f32 %v1097_v22, %v365_v18  ;;  %v1771_v26 = vadd.f32 %v1179_v23, %v373_v19  ;;  %v1099_v27 = vpop.f32.mrb[5].mxu0  ;;  %v1181_v28 = vpop.f32.mrb[5].mxu1 }
 0x241   :  { %v1770_v30 = vadd.f32 %v1099_v27, %v369_v20  ;;  %v1772_v31 = vadd.f32 %v1181_v28, %v377_v21  ;;  %v1101_v32 = vpop.f32.mrb[6].mxu0  ;;  %v1183_v33 = vpop.f32.mrb[6].mxu1 }
 0x242   :  { %v1186_v13 = vmax.f32 %v1769_v24, 0.0  ;;  %v1188_v34 = vmax.f32 %v1771_v26, 0.0  ;;  %v1102_v35 = vpop.f32.mrb[7].mxu0  ;;  %v1184_v29 = vpop.f32.mrb[7].mxu1 }
 0x243   :  { %v1187_v36 = vmax.f32 %v1770_v30, 0.0  ;;  %v1189_v37 = vmax.f32 %v1772_v31, 0.0 }
 0x244   :  { %v1190_v12 = vpack.c.bf16 %v1186_v13, %v1186_v13  ;;  %v1192_v16 = vpack.c.bf16 %v1188_v34, %v1188_v34 }
 0x245   :  { %v1191_v15 = vpack.c.bf16 %v1187_v36, %v1187_v36  ;;  %v1193_v38 = vpack.c.bf16 %v1189_v37, %v1189_v37 }
 0x247   :  { %1489 = vmatprep.mubr.bf16.mxu0 %v1191_v15  ;;  %1529 = vmatprep.mubr.bf16.mxu1 %v1193_v38 }
 0x248   :  { %1490 = vmatmul.mubr.bf16.vlgmr.msra.gmra.mrb[8].mxu0 %v1190_v12  ;;  %1530 = vmatmul.mubr.bf16.vlgmr.msra.gmra.mrb[8].mxu1 %v1192_v16 }
 0x31b   :  { %v1741_v39 = vpop.f32.mrb[8].mxu0  ;;  %v1763_v40 = vpop.f32.mrb[8].mxu1 }
 0x31c   :  { %v1742_v42 = vpop.f32.mrb[9].mxu0  ;;  %v1764_v43 = vpop.f32.mrb[9].mxu1 }
 0x31d   :  { %v1743_v44 = vadd.f32 %v1742_v42, %v1741_v39  ;;  %v1765_v14 = vadd.f32 %v1764_v43, %v1763_v40  ;;  %v1744_v45 = vpop.f32.mrb[10].mxu0  ;;  %v1766_v46 = vpop.f32.mrb[10].mxu1 }
 0x31e   :  { %v1745_v47 = vpop.f32.mrb[11].mxu0  ;;  %v1767_v48 = vpop.f32.mrb[11].mxu1 }
 0x31f   :  { %v1492_v25 = vadd.f32 %v1743_v44, %v1692_v41 }
 0x321   :  { %v1532_v49 = vadd.f32 %v1765_v14, %v1492_v25 }
 0x323   :  { %v1537_v50 = vmax.f32 %v1532_v49, 0.0 }
 0x325   :  { %1538 = vst [vmem:[#allocation10] sm:$0xff] %v1537_v50 }
 0x326   :  { %2120 = shalt.err (!%p2117_p8)
}
 0x327   :  { %s2121_s10 = scalar_lea.hbm %s2302_s7, 128 }
 0x328   :  { %p2122_p9 = scmp.ne.s32.totalorder %s2302_s7, %s2121_s10  ;;  %p2125_p10 = scmp.lt.u32.totalorder %s2121_s10, %s2302_s7 }
 0x32a   :  { %p2127_p11 = pnand %p2125_p10, %p2122_p9 }
 0x32c   :  { %2130 = shalt.err (!%p2127_p11)
}
 0x32d   :  { %1548 = dma.vmem_to_hbm [thread:$0]  %s1546_s30, 128, %s2302_s7, [#allocation4]  }
 0x32e   :  { %2137 = dma.done.wait [#allocation4], 128  }
 0x32f   :  { %2138 = vsyncadd [#allocation4], 4294967168 }
 0x330   :  { %1552 = vsyncpa [#allocation3], 1 }
 0x331   :  { %1553 = vsyncpa [#allocation6], 1 }
 0x332   :  { %1554 = vsyncpa [#allocation9], 1 }
 0x333   :  { %1555 = vsyncpa [#allocation4], 1 }

</bundles_post_ra>
